<compile_context>
chip_gen: v5e
topology: v5e:2x2
jax: 0.10.0
libtpu: 0.0.40
codegen_flags: <defaults>
</compile_context>

<pallas_src>
import functools

import jax
import jax.numpy as jnp
from jax.experimental import pallas as pl
from jax.experimental.pallas import tpu as pltpu

LN_EPS = 1e-5


def adapter_kernel(x_ref, ln_w_ref, ln_b_ref, wd_ref, bd_ref, wu_ref, bu_ref,
                   o_ref):
    # --- LayerNorm ('in' option): statistics in f32 (row-wise) ---
    xf = x_ref[...].astype(jnp.float32)
    mean = jnp.mean(xf, axis=-1, keepdims=True)
    centered = xf - mean
    var = jnp.mean(centered * centered, axis=-1, keepdims=True)
    inv = jax.lax.rsqrt(var + LN_EPS)
    xn = centered * inv * ln_w_ref[...].astype(jnp.float32) \
         + ln_b_ref[...].astype(jnp.float32)

    # --- down_proj + ReLU (MXU operands in the weight dtype, f32 accumulate) ---
    down = jnp.dot(xn.astype(wd_ref.dtype), wd_ref[...],
                   preferred_element_type=jnp.float32) \
           + bd_ref[...].astype(jnp.float32)
    down = jnp.maximum(down, 0.0)
    # dropout p=0.0 (eval semantics) -> identity.

    # --- up_proj (scale already folded into W_up / b_up in the wrapper) ---
    up = jnp.dot(down.astype(wu_ref.dtype), wu_ref[...],
                 preferred_element_type=jnp.float32) \
         + bu_ref[...].astype(jnp.float32)

    # --- residual add.  Re-read x here (cheap VMEM load) instead of keeping an
    # f32 copy of the whole tile live across both matmuls. ---
    o_ref[...] = (up + x_ref[...].astype(jnp.float32)).astype(o_ref.dtype)


def _round_up(a, b):
    return (a + b - 1) // b * b


def _cdiv(a, b):
    return -(-a // b)


def adapter_forward(x, ln_w, ln_b, w_down, b_down, w_up, b_up,
                    *, scale=1.0, tile_rows=None):
    """x: (N, D).  Weights in math layout: W_down (D, R), W_up (R, D)."""
    N, D = x.shape
    R = w_down.shape[1]

    # ---- parameter prep (O(D*R): negligible vs. the x traffic) ----
    # Fold the adapter scale into the up projection.
    if float(scale) != 1.0:
        w_up = w_up * jnp.asarray(scale, w_up.dtype)
        b_up = b_up * jnp.asarray(scale, b_up.dtype)
    # Lane-dense bottleneck: zero-pad R to a multiple of 128 (bit-identical).
    R_pad = _round_up(R, 128)
    if R_pad != R:
        w_down = jnp.pad(w_down, ((0, 0), (0, R_pad - R)))
        b_down = jnp.pad(b_down, ((0, 0), (0, R_pad - R)))
        w_up = jnp.pad(w_up, ((0, R_pad - R), (0, 0)))

    itemsize = jnp.dtype(x.dtype).itemsize
    w_itemsize = jnp.dtype(w_down.dtype).itemsize
    min_rows = max(8, 32 // itemsize)        # 8 for f32, 16 for bf16, 32 for i8

    # ---- VMEM budget (hardware-aware) ----
    try:
        vmem_cap = int(pltpu.get_tpu_info().vmem_capacity_bytes)
    except Exception:
        vmem_cap = 64 << 20                  # conservative (v7x per-TC VMEM)
    budget = max(24 << 20, vmem_cap - (8 << 20))

    # Weights/biases are double-buffered by the default pipeline (constant
    # index maps); count both buffers.
    weight_bytes = 2 * (2 * D * R_pad * w_itemsize + (3 * D + R_pad) * 4)
    # Per-row footprint: double-buffered x + out tiles, plus live f32
    # intermediates xn, up (tm, D) and down (tm, R_pad).
    row_bytes = 4 * D * itemsize + 2 * D * 4 + R_pad * 4

    tm_budget = (budget - weight_bytes - (4 << 20)) // row_bytes
    tm_budget = max(min_rows, (tm_budget // min_rows) * min_rows)

    if tile_rows is None:
        # Big tiles for the HBM roofline; grow toward 2048 rows when D is
        # small (v5e is purely DMA-bound), stay at 512 for large D.
        target_rows = int(min(2048, max(512, (8 << 20) // max(1, D * itemsize))))
    else:
        target_rows = int(tile_rows)

    tm = min(target_rows, tm_budget, _round_up(N, min_rows))
    tm = max(min_rows, (tm // min_rows) * min_rows)

    # v7x has 2 TensorCores: make sure the parallel grid has >= 2 steps.
    if _cdiv(N, tm) < 2 and tm > min_rows:
        tm = max(min_rows, _round_up(_cdiv(N, 2), min_rows))

    grid = (_cdiv(N, tm),)   # ragged tail handled by masked tail stores

    need = (2 * tm * D * itemsize          # x (double-buffered)
            + 2 * tm * D * itemsize        # out (double-buffered)
            + 2 * tm * D * 4               # f32 xn, up
            + tm * R_pad * 4               # f32 down
            + weight_bytes)
    vmem_limit = int(min(max(32 << 20, need + (8 << 20)), vmem_cap - (2 << 20)))

    out = pl.pallas_call(
        adapter_kernel,
        out_shape=jax.ShapeDtypeStruct((N, D), x.dtype),
        grid_spec=pltpu.PrefetchScalarGridSpec(
            num_scalar_prefetch=0,
            grid=grid,
            in_specs=[
                pl.BlockSpec((tm, D), lambda i: (i, 0)),       # x tile
                pl.BlockSpec((1, D), lambda i: (0, 0)),        # ln weight
                pl.BlockSpec((1, D), lambda i: (0, 0)),        # ln bias
                pl.BlockSpec((D, R_pad), lambda i: (0, 0)),    # W_down (resident)
                pl.BlockSpec((1, R_pad), lambda i: (0, 0)),    # b_down
                pl.BlockSpec((R_pad, D), lambda i: (0, 0)),    # W_up (resident)
                pl.BlockSpec((1, D), lambda i: (0, 0)),        # b_up
            ],
            out_specs=pl.BlockSpec((tm, D), lambda i: (i, 0)),
        ),
        compiler_params=pltpu.CompilerParams(
            dimension_semantics=("parallel",),
            vmem_limit_bytes=vmem_limit),
    )(x, ln_w, ln_b, w_down, b_down, w_up, b_up)

    return out


def adapter_reference(x, ln_w, ln_b, w_down, b_down, w_up, b_up, scale=1.0):
    mean = jnp.mean(x, axis=-1, keepdims=True)
    var = jnp.mean((x - mean) ** 2, axis=-1, keepdims=True)
    xn = (x - mean) * jax.lax.rsqrt(var + LN_EPS) * ln_w + ln_b
    down = jnp.maximum(xn @ w_down + b_down, 0.0)
    up = (down @ w_up + b_up) * scale
    return up + x


if __name__ == "__main__":
    # Small shapes consistent with the module: batch=2, seq=8, d_model=128,
    # bottleneck=32.
    batch, seq, d_model, bottleneck = 2, 8, 128, 32
    key = jax.random.PRNGKey(0)
    kx, kd, ku = jax.random.split(key, 3)

    x = jax.random.normal(kx, (batch, seq, d_model), dtype=jnp.float32)

    # Deterministic "bert" init: weights ~ N(0, 0.02), biases zero,
    # LayerNorm weight=1, bias=0.
    w_down = 0.02 * jax.random.normal(kd, (d_model, bottleneck), jnp.float32)
    b_down = jnp.zeros((1, bottleneck), jnp.float32)
    w_up = 0.02 * jax.random.normal(ku, (bottleneck, d_model), jnp.float32)
    b_up = jnp.zeros((1, d_model), jnp.float32)
    ln_w = jnp.ones((1, d_model), jnp.float32)
    ln_b = jnp.zeros((1, d_model), jnp.float32)

    x2d = x.reshape(batch * seq, d_model)
    out = adapter_forward(x2d, ln_w, ln_b, w_down, b_down, w_up, b_up,
                          scale=1.0)
    out = jax.block_until_ready(out).reshape(batch, seq, d_model)

    ref = adapter_reference(x2d, ln_w, ln_b, w_down, b_down, w_up, b_up,
                            scale=1.0).reshape(batch, seq, d_model)
    assert jnp.allclose(out, ref, atol=1e-5, rtol=1e-5), "mismatch vs reference"
    print("KERNEL_OK")
</pallas_src>

<mosaic_0001>
module attributes {stable_mosaic.version = 11 : i64} {
  func.func @adapter_kernel(%arg0: i32, %arg1: memref<8x128xf32, #tpu.memory_space<vmem>>, %arg2: memref<1x128xf32, #tpu.memory_space<vmem>>, %arg3: memref<1x128xf32, #tpu.memory_space<vmem>>, %arg4: memref<128x128xf32, #tpu.memory_space<vmem>>, %arg5: memref<1x128xf32, #tpu.memory_space<vmem>>, %arg6: memref<128x128xf32, #tpu.memory_space<vmem>>, %arg7: memref<1x128xf32, #tpu.memory_space<vmem>>, %arg8: memref<8x128xf32, #tpu.memory_space<vmem>>) attributes {dimension_semantics = [#tpu.dimension_semantics<parallel>], iteration_bounds = array<i64: 2>, scalar_prefetch = 0 : i64, scratch_operands = 0 : i64, tpu.core_type = #tpu.core_type<tc>, window_params = [{transform_indices = @transform_0, window_bounds = array<i64: 8, 128>}, {pipeline_mode = #tpu.pipeline_mode<synchronous>, transform_indices = @transform_1, window_bounds = array<i64: 1, 128>}, {pipeline_mode = #tpu.pipeline_mode<synchronous>, transform_indices = @transform_2, window_bounds = array<i64: 1, 128>}, {pipeline_mode = #tpu.pipeline_mode<synchronous>, transform_indices = @transform_3, window_bounds = array<i64: 128, 128>}, {pipeline_mode = #tpu.pipeline_mode<synchronous>, transform_indices = @transform_4, window_bounds = array<i64: 1, 128>}, {pipeline_mode = #tpu.pipeline_mode<synchronous>, transform_indices = @transform_5, window_bounds = array<i64: 128, 128>}, {pipeline_mode = #tpu.pipeline_mode<synchronous>, transform_indices = @transform_6, window_bounds = array<i64: 1, 128>}, {transform_indices = @transform_7, window_bounds = array<i64: 8, 128>}]} {
    %c0 = arith.constant 0 : index
    %c0_0 = arith.constant 0 : index
    %0 = vector.load %arg1[%c0, %c0_0] : memref<8x128xf32, #tpu.memory_space<vmem>>, vector<8x128xf32>
    %cst = arith.constant dense<0.000000e+00> : vector<8xf32>
    %1 = vector.multi_reduction <add>, %0, %cst [1] : vector<8x128xf32> to vector<8xf32>
    %2 = vector.shape_cast %1 : vector<8xf32> to vector<8x1xf32>
    %cst_1 = arith.constant 1.280000e+02 : f32
    %3 = vector.broadcast %cst_1 : f32 to vector<8x1xf32>
    %4 = arith.divf %2, %3 : vector<8x1xf32>
    %5 = vector.broadcast %4 : vector<8x1xf32> to vector<8x128xf32>
    %6 = arith.subf %0, %5 : vector<8x128xf32>
    %7 = arith.mulf %6, %6 : vector<8x128xf32>
    %cst_2 = arith.constant dense<0.000000e+00> : vector<8xf32>
    %8 = vector.multi_reduction <add>, %7, %cst_2 [1] : vector<8x128xf32> to vector<8xf32>
    %9 = vector.shape_cast %8 : vector<8xf32> to vector<8x1xf32>
    %cst_3 = arith.constant 1.280000e+02 : f32
    %10 = vector.broadcast %cst_3 : f32 to vector<8x1xf32>
    %11 = arith.divf %9, %10 : vector<8x1xf32>
    %cst_4 = arith.constant 9.99999974E-6 : f32
    %12 = vector.broadcast %cst_4 : f32 to vector<8x1xf32>
    %13 = arith.addf %11, %12 : vector<8x1xf32>
    %14 = math.rsqrt %13 : vector<8x1xf32>
    %15 = vector.broadcast %14 : vector<8x1xf32> to vector<8x128xf32>
    %16 = arith.mulf %6, %15 : vector<8x128xf32>
    %c0_5 = arith.constant 0 : index
    %c0_6 = arith.constant 0 : index
    %17 = vector.load %arg2[%c0_5, %c0_6] : memref<1x128xf32, #tpu.memory_space<vmem>>, vector<1x128xf32>
    %18 = vector.broadcast %17 : vector<1x128xf32> to vector<8x128xf32>
    %19 = arith.mulf %16, %18 : vector<8x128xf32>
    %c0_7 = arith.constant 0 : index
    %c0_8 = arith.constant 0 : index
    %20 = vector.load %arg3[%c0_7, %c0_8] : memref<1x128xf32, #tpu.memory_space<vmem>>, vector<1x128xf32>
    %21 = vector.broadcast %20 : vector<1x128xf32> to vector<8x128xf32>
    %22 = arith.addf %19, %21 : vector<8x128xf32>
    %c0_9 = arith.constant 0 : index
    %c0_10 = arith.constant 0 : index
    %23 = vector.load %arg4[%c0_9, %c0_10] : memref<128x128xf32, #tpu.memory_space<vmem>>, vector<128x128xf32>
    %cst_11 = arith.constant dense<0.000000e+00> : vector<8x128xf32>
    %24 = tpu.matmul %22, %23, %cst_11 {dimension_numbers = #tpu.dot_dimension_numbers<[1], [0], [0], [1], [0, 0, 1, 1], [], []>} : vector<8x128xf32>, vector<128x128xf32>, vector<8x128xf32> -> vector<8x128xf32>
    %c0_12 = arith.constant 0 : index
    %c0_13 = arith.constant 0 : index
    %25 = vector.load %arg5[%c0_12, %c0_13] : memref<1x128xf32, #tpu.memory_space<vmem>>, vector<1x128xf32>
    %26 = vector.broadcast %25 : vector<1x128xf32> to vector<8x128xf32>
    %27 = arith.addf %24, %26 : vector<8x128xf32>
    %cst_14 = arith.constant 0.000000e+00 : f32
    %28 = vector.broadcast %cst_14 : f32 to vector<8x128xf32>
    %29 = arith.maximumf %27, %28 : vector<8x128xf32>
    %c0_15 = arith.constant 0 : index
    %c0_16 = arith.constant 0 : index
    %30 = vector.load %arg6[%c0_15, %c0_16] : memref<128x128xf32, #tpu.memory_space<vmem>>, vector<128x128xf32>
    %cst_17 = arith.constant dense<0.000000e+00> : vector<8x128xf32>
    %31 = tpu.matmul %29, %30, %cst_17 {dimension_numbers = #tpu.dot_dimension_numbers<[1], [0], [0], [1], [0, 0, 1, 1], [], []>} : vector<8x128xf32>, vector<128x128xf32>, vector<8x128xf32> -> vector<8x128xf32>
    %c0_18 = arith.constant 0 : index
    %c0_19 = arith.constant 0 : index
    %32 = vector.load %arg7[%c0_18, %c0_19] : memref<1x128xf32, #tpu.memory_space<vmem>>, vector<1x128xf32>
    %33 = vector.broadcast %32 : vector<1x128xf32> to vector<8x128xf32>
    %34 = arith.addf %31, %33 : vector<8x128xf32>
    %c0_20 = arith.constant 0 : index
    %c0_21 = arith.constant 0 : index
    %35 = vector.load %arg1[%c0_20, %c0_21] : memref<8x128xf32, #tpu.memory_space<vmem>>, vector<8x128xf32>
    %36 = arith.addf %34, %35 : vector<8x128xf32>
    %c0_22 = arith.constant 0 : index
    %c0_23 = arith.constant 0 : index
    %37 = vector.load %arg8[%c0_22, %c0_23] : memref<8x128xf32, #tpu.memory_space<vmem>>, vector<8x128xf32>
    tpu.vector_store %arg8[%c0_22, %c0_23], %36 {strides = array<i32>} : memref<8x128xf32, #tpu.memory_space<vmem>>, vector<8x128xf32>,
    return
  }
  func.func @transform_0(%arg0: i32) -> (i32, i32) {
    %c0_i32 = arith.constant 0 : i32
    %c0_i32_0 = arith.constant 0 : i32
    return %arg0, %c0_i32 : i32, i32
  }
  func.func @transform_1(%arg0: i32) -> (i32, i32) {
    %c0_i32 = arith.constant 0 : i32
    %c0_i32_0 = arith.constant 0 : i32
    %c0_i32_1 = arith.constant 0 : i32
    return %c0_i32, %c0_i32_0 : i32, i32
  }
  func.func @transform_2(%arg0: i32) -> (i32, i32) {
    %c0_i32 = arith.constant 0 : i32
    %c0_i32_0 = arith.constant 0 : i32
    %c0_i32_1 = arith.constant 0 : i32
    return %c0_i32, %c0_i32_0 : i32, i32
  }
  func.func @transform_3(%arg0: i32) -> (i32, i32) {
    %c0_i32 = arith.constant 0 : i32
    %c0_i32_0 = arith.constant 0 : i32
    %c0_i32_1 = arith.constant 0 : i32
    return %c0_i32, %c0_i32_0 : i32, i32
  }
  func.func @transform_4(%arg0: i32) -> (i32, i32) {
    %c0_i32 = arith.constant 0 : i32
    %c0_i32_0 = arith.constant 0 : i32
    %c0_i32_1 = arith.constant 0 : i32
    return %c0_i32, %c0_i32_0 : i32, i32
  }
  func.func @transform_5(%arg0: i32) -> (i32, i32) {
    %c0_i32 = arith.constant 0 : i32
    %c0_i32_0 = arith.constant 0 : i32
    %c0_i32_1 = arith.constant 0 : i32
    return %c0_i32, %c0_i32_0 : i32, i32
  }
  func.func @transform_6(%arg0: i32) -> (i32, i32) {
    %c0_i32 = arith.constant 0 : i32
    %c0_i32_0 = arith.constant 0 : i32
    %c0_i32_1 = arith.constant 0 : i32
    return %c0_i32, %c0_i32_0 : i32, i32
  }
  func.func @transform_7(%arg0: i32) -> (i32, i32) {
    %c0_i32 = arith.constant 0 : i32
    %c0_i32_0 = arith.constant 0 : i32
    return %arg0, %c0_i32 : i32, i32
  }
}

</mosaic_0001>

<bundles_post_ra>
// kernel: tpu_custom_call.1
= control target key start
LH: loop header
LB: loop body
LE: loop exit
PB: predicated region body
PF: predicated region fallthrough
CT: control target
= control target key end

     0   :  { %s1109_s0 = inlined_call_operand.hbm [shape: f32[16,128], index: 0, kind: input, shape index: {}]   ;;  %s1110_s1 = inlined_call_operand.hbm [shape: f32[1,128], index: 1, kind: input, shape index: {}]   ;;  %s1111_s2 = inlined_call_operand.vmem [shape: f32[1,128], index: 2, kind: input, shape index: {}]   ;;  %s1112_s3 = inlined_call_operand.hbm [shape: f32[128,128], index: 3, kind: input, shape index: {}]   ;;  %s1113_s4 = inlined_call_operand.vmem [shape: f32[1,128], index: 4, kind: input, shape index: {}]   ;;  %s1114_s5 = inlined_call_operand.hbm [shape: f32[128,128], index: 5, kind: input, shape index: {}]   ;;  %s1115_s6 = inlined_call_operand.vmem [shape: f32[1,128], index: 6, kind: input, shape index: {}]   ;;  %s1116_s7 = inlined_call_operand.hbm [shape: f32[16,128], index: 7, kind: output, shape index: {}]  }
   0x1   :  { %1117 = sst [smem:[#allocation15_spill]] %s1110_s1 }
   0x2   :  { %12 = vsyncpa [#allocation3], 0 }
   0x3   :  { %14 = vsyncpa [#allocation3 + $0x1], 0 }
   0x4   :  { %15 = vsyncpa [#allocation6], 0 }
   0x5   :  { %16 = vsyncpa [#allocation9], 0 }
   0x6   :  { %17 = vsyncpa [#allocation4], 0 }
   0x7   :  { %19 = vsyncpa [#allocation4 + $0x1], 0  ;;  %s928_s24 = smov 0   ;;  %s930_s25 = smov 0  }
   0x8   :  { %s932_s26 = smov 0   ;;  %s934_s27 = smov 0  }
   0x9 LB: > { %s949_s28 = sadd.s32 4294967295, %s880_s27   ;;  %s580_s29 = sadd.s32 4294967294, %s880_s27   ;;  %s880_s27 = sphi %s934_s27, %s1129_s27   ;;  %s876_s26 = sphi %s932_s26, %s1128_s26   ;;  %s872_s25 = sphi %s930_s25, %s1127_s25   ;;  %s868_s24 = sphi %s928_s24, %s1126_s24  }
   0xa   : > { %p45_p0 = scmp.ne.s32.totalorder %s872_s25, %s868_s24  ;;  %p46_p1 = scmp.eq.s32.totalorder %s949_s28, 0 }
   0xb   : > { %p195_p2 = scmp.eq.s32.totalorder %s949_s28, 1  ;;  %p201_p3 = scmp.eq.s32.totalorder %s580_s29, 1 }
   0xc   : > { %p958_p4 = por %p46_p1, %p45_p0  ;;  %p581_p5 = scmp.ge.s32.totalorder %s880_s27, 1 }
   0xd   : > { %p963_p6 = por %p201_p3, %p45_p0  ;;  %p208_p7 = scmp.lt.s32.totalorder %s880_s27, 3 }
   0xe   : > { %s1120_s1 = sld [smem:[#allocation15_spill]]  ;;  %s882_s13 = smov [#allocation5]  }
   0xf   : > { %p971_p8 = pnand %p581_p5, %p208_p7  ;;  %s222_s14 = sshll.u32 %s882_s13, 4  ;;  %s223_s14 = int_to_ptr.vmem [resolvable:$true] %s222_s14 }
  0x10   : > { %s234_s17 = sshll.u32 %s1112_s3, 4  ;;  %s883_s19 = smov [#allocation7]   ;;  %s235_s17 = int_to_ptr.hbm [resolvable:$true] %s234_s17 }
  0x11   : > { %p614_p10 = pneg %p971_p8  ;;  %s236_s20 = sshll.u32 %s883_s19, 4  ;;  %s237_s20 = int_to_ptr.vmem [resolvable:$true] %s236_s20 }
  0x12   : > { %s884_s21 = smov 128   ;;  %s885_s22 = smov 8  }
  0x13   : > { %p983_p11 = pnand %p614_p10, %p46_p1  ;;  %s251_s9 = sshll.u32 %s1114_s5, 4  ;;  %s252_s9 = int_to_ptr.hbm [resolvable:$true] %s251_s9 }
  0x14   : > { %s220_s11 = sshll.u32 %s1120_s1, 4  ;;  %s886_s10 = smov [#allocation8]   ;;  %s221_s11 = int_to_ptr.hbm [resolvable:$true] %s220_s11 }
  0x15   : > { %617 = dma.hbm_to_vmem [thread:$0]  (!%p983_p11), %s221_s11, 16, %s223_s14, [#allocation6]  }
  0x16   : > { %620 = dma.hbm_to_vmem [thread:$0]  (!%p983_p11), %s235_s17, 2048, %s237_s20, [#allocation6], %s884_s21, %s884_s21, %s885_s22  }
  0x17   : > { %s253_s13 = sshll.u32 %s886_s10, 4  ;;  %s997_s11 = sadd.s32 1, %s880_s27   ;;  %s254_s13 = int_to_ptr.vmem [resolvable:$true] %s253_s13 }
  0x18   : > { %623 = dma.hbm_to_vmem [thread:$0]  (!%p983_p11), %s252_s9, 2048, %s254_s13, [#allocation9], %s884_s21, %s884_s21, %s885_s22  }
  0x19   : > { %s29_s14 = ssub.s32 %s880_s27, %s997_s11  ;;  %s32_s15 = sadd.s32 1, %s876_s26 }
  0x1a   : > { %p30_p12 = scmp.eq.s32.totalorder %s29_s14, 0  ;;  %p39_p13 = scmp.ne.s32.totalorder %s876_s26, %s872_s25 }
  0x1b   : > { %p40_p0 = scmp.eq.s32.totalorder %s880_s27, 0  ;;  %p635_p5 = scmp.lt.s32.totalorder %s880_s27, 2 }
  0x1c   : > { %s1006_s16 = scalar_select %p30_p12, %s876_s26, %s32_s15  }
  0x1d   : > { %p1010_p3 = por %p195_p2, %p39_p13  ;;  %s270_s19 = sand.u32 1, %s876_s26  }
  0x1e   : > { %s587_s20 = sshll.u32 %s880_s27, 3  ;;  %p41_p7 = por %p40_p0, %p39_p13 }
  0x1f   : > { %s586_s18 = sshll.u32 %s270_s19, 3  ;;  %s278_s23 = scalar_lea.hbm %s1109_s0, %s587_s20 }
  0x20   : > { %s280_s29 = sshll.u32 %s278_s23, 4  ;;  %s274_s9 = scalar_lea.vmem [#allocation2], %s586_s18  ;;  %s281_s29 = int_to_ptr.hbm [resolvable:$true] %s280_s29 }
  0x21   : > { %s282_s10 = sshll.u32 %s274_s9, 4  ;;  %p1020_p10 = pnand %p635_p5, %p41_p7  ;;  %s283_s10 = int_to_ptr.vmem [resolvable:$true] %s282_s10 }
  0x22   : > { %s271_s14 = scalar_lea.sflag [#allocation3], %s270_s19  ;;  %s776_s15 = sshra.s32 %s281_s29, 4  ;;  %s777_s15 = int_to_ptr.hbm [resolvable:$true] %s776_s15 }
  0x23   : > { %s778_s1 = scalar_lea.hbm %s777_s15, 8  ;;  %p780_p11 = pneg %p1020_p10 }
  0x24   : > { %p779_p2 = scmp.ne.s32.totalorder %s777_s15, %s778_s1  ;;  %s783_s18 = scalar_lea.hbm %s1109_s0, 16 }
  0x25   : > { %p784_p0 = scmp.lt.s32.totalorder %s777_s15, %s1109_s0  ;;  %p785_p5 = scmp.lt.s32.totalorder %s783_s18, %s778_s1 }
  0x26   : > { %p781_p12 = pnand %p780_p11, %p779_p2 }
  0x27   : > { %p786_p7 = por %p785_p5, %p784_p0 }
  0x28   : > { %p782_p13 = pneg %p781_p12 }
  0x2a   : > { %p787_p9 = pnand %p786_p7, %p782_p13 }
  0x2c   : > { %790 = shalt.err (!%p787_p9)
}
  0x2d   : > { %627 = dma.hbm_to_vmem [thread:$0]  (!%p1020_p10), %s281_s29, 128, %s283_s10, %s271_s14  }
  0x2e   : > { %291 = sbr.rel (%p971_p8) target bundleno = 586 (0x24a), region = 48  ;;  %s1037_s19 = sand.u32 (!%p971_p8), 1, %s872_s25  }
  0x2f   : > { %s589_s9 = sshll.u32 (!%p971_p8), %s1037_s19, 3  ;;  %s294_s20 = scalar_lea.sflag (!%p971_p8), [#allocation3], %s1037_s19 }
  0x30   : > { %s297_s1 = scalar_lea.vmem (!%p971_p8), [#allocation2], %s589_s9 }
  0x33   : > { %851 = dma.done.wait (%p958_p4), %s294_s20, 128  }
  0x34   : > { %853 = vsyncadd (%p958_p4), %s294_s20, 4294967168 }
  0x35   : > { %855 = dma.done.wait (%p46_p1), [#allocation6], 2064  }
  0x36   : > { %857 = vsyncadd (%p46_p1), [#allocation6], 4294965232 }
  0x37   : > { %859 = dma.done.wait (%p46_p1), [#allocation9], 2048  }
  0x38   : > { %861 = vsyncadd (%p46_p1), [#allocation9], 4294965248  ;;  %v1055_v0 = vld [vmem:[%s297_s1] sm:$0xff]  ;;  %v887_v1 = vmov 128.0   ;;  %v394_v15 = vld [vmem:[#allocation7 + $0x60] sm:$0xff]  ;;  %s595_s13 = sshll.u32 %s949_s28, 3 }
  0x39   : > { %345 = vadd.xlane.f32.xlu0 %v1055_v0  ;;  %682 = vrcp.f32 %v887_v1  ;;  %v397_v2 = vld [vmem:[#allocation7 + $0x78] sm:$0xff]  ;;  %v396_v3 = vld [vmem:[#allocation7 + $0x70] sm:$0xff]  ;;  %v395_v14 = vld [vmem:[#allocation7 + $0x68] sm:$0xff]  ;;  %s476_s22 = scalar_lea.hbm %s1116_s7, %s595_s13  ;;  %s343_s23 = scalar_lea.vmem [#allocation10], %s589_s9 }
  0x3a   : > { %402 = vmatpush.msra.mxu0 %v397_v2  ;;  %v393_v16 = vld [vmem:[#allocation7 + $0x58] sm:$0xff]  ;;  %v392_v17 = vld [vmem:[#allocation7 + $0x50] sm:$0xff]  ;;  %v391_v18 = vld [vmem:[#allocation7 + $0x48] sm:$0xff]  ;;  %s478_s20 = sshll.u32 %s343_s23, 4  ;;  %s480_s1 = sshll.u32 %s476_s22, 4  ;;  %s479_s20 = int_to_ptr.vmem [resolvable:$true] %s478_s20  ;;  %s481_s1 = int_to_ptr.hbm [resolvable:$true] %s480_s1 }
  0x3b   : > { %v390_v19 = vld [vmem:[#allocation7 + $0x40] sm:$0xff]  ;;  %v389_v20 = vld [vmem:[#allocation7 + $0x38] sm:$0xff]  ;;  %v388_v21 = vld [vmem:[#allocation7 + $0x30] sm:$0xff]  ;;  %s466_s28 = scalar_lea.sflag [#allocation4], %s1037_s19  ;;  %s820_s30 = sshra.s32 %s481_s1, 4  ;;  %s821_s30 = int_to_ptr.hbm [resolvable:$true] %s820_s30 }
  0x3c   : > { %403 = vmatpush.msra.mxu0 %v396_v3  ;;  %v387_v22 = vld [vmem:[#allocation7 + $0x28] sm:$0xff]  ;;  %v386_v23 = vld [vmem:[#allocation7 + $0x20] sm:$0xff]  ;;  %v385_v24 = vld [vmem:[#allocation7 + $0x18] sm:$0xff]  ;;  %s822_s12 = scalar_lea.hbm %s821_s30, 8  ;;  %s826_s9 = scalar_lea.hbm %s1116_s7, 16 }
  0x3d   : > { %v384_v25 = vld [vmem:[#allocation7 + $0x10] sm:$0xff]  ;;  %v383_v26 = vld [vmem:[#allocation7 + $0x8] sm:$0xff]  ;;  %v382_v27 = vld [vmem:[#allocation7] sm:$0xff]  ;;  %p823_p1 = scmp.ne.s32.totalorder %s821_s30, %s822_s12  ;;  %p827_p9 = scmp.lt.s32.totalorder %s821_s30, %s1116_s7 }
  0x3e   : > { %404 = vmatpush.msra.mxu0 %v395_v14  ;;  %v438_v28 = vld [vmem:[#allocation8 + $0x78] sm:$0xff]  ;;  %v437_v29 = vld [vmem:[#allocation8 + $0x70] sm:$0xff]  ;;  %v436_v30 = vld [vmem:[#allocation8 + $0x68] sm:$0xff]  ;;  %p828_p10 = scmp.lt.s32.totalorder %s826_s9, %s822_s12 }
  0x3f   : > { %v683_v4 = vpop.eup %682  ;;  %443 = vmatpush.msra.mxu1 %v438_v28  ;;  %v435_v33 = vld [vmem:[#allocation8 + $0x60] sm:$0xff]  ;;  %v434_v35 = vld [vmem:[#allocation8 + $0x58] sm:$0xff]  ;;  %v433_v36 = vld [vmem:[#allocation8 + $0x50] sm:$0xff]  ;;  %p824_p4 = pnand %p823_p1, %p1010_p3 }
  0x40   : > { %v348_v5 = vmul.f32 128.0, %v683_v4  ;;  %vm352_vm0 = vweird.f32 %v683_v4  ;;  %405 = vmatpush.msra.mxu0 %v394_v15  ;;  %v432_v37 = vld [vmem:[#allocation8 + $0x48] sm:$0xff]  ;;  %v431_v38 = vld [vmem:[#allocation8 + $0x40] sm:$0xff]  ;;  %v430_v40 = vld [vmem:[#allocation8 + $0x38] sm:$0xff]  ;;  %p829_p2 = por %p828_p10, %p827_p9 }
  0x41   : > { %444 = vmatpush.msra.mxu1 %v437_v29  ;;  %v429_v42 = vld [vmem:[#allocation8 + $0x30] sm:$0xff]  ;;  %v428_v44 = vld [vmem:[#allocation8 + $0x28] sm:$0xff]  ;;  %v427_v46 = vld [vmem:[#allocation8 + $0x20] sm:$0xff]  ;;  %p825_p8 = pneg %p824_p4 }
  0x42   : > { %v349_v6 = vsub.f32 1.0, %v348_v5  ;;  %406 = vmatpush.msra.mxu0 %v393_v16  ;;  %v426_v48 = vld [vmem:[#allocation8 + $0x18] sm:$0xff]  ;;  %v679_v53 = vld [vmem:[%s1111_s2] ss:$0 sm:$0xff]  ;;  %v425_v56 = vld [vmem:[#allocation8 + $0x10] sm:$0xff] }
  0x43   : > { %445 = vmatpush.msra.mxu1 %v436_v30  ;;  %v678_v50 = vld [vmem:[#allocation5] ss:$0 sm:$0xff]  ;;  %v424_v57 = vld [vmem:[#allocation8 + $0x8] sm:$0xff]  ;;  %v423_v58 = vld [vmem:[#allocation8] sm:$0xff]  ;;  %p830_p11 = pnand %p829_p2, %p825_p8 }
  0x44   : > { %v350_v7 = vmul.f32 %v683_v4, %v349_v6  ;;  %407 = vmatpush.msra.mxu0 %v392_v17  ;;  %v680_v59 = vld [vmem:[%s1113_s4] ss:$0 sm:$0xff] }
  0x45   : > { %446 = vmatpush.msra.mxu1 %v435_v33  ;;  %v681_v63 = vld [vmem:[%s1115_s6] ss:$0 sm:$0xff] }
  0x46   : > { %v351_v8 = vadd.f32 %v683_v4, %v350_v7  ;;  %408 = vmatpush.msra.mxu0 %v391_v18 }
  0x47   : > { %447 = vmatpush.msra.mxu1 %v434_v35 }
  0x48   : > { %v353_v9 = vsel %vm352_vm0, %v683_v4, %v351_v8  ;;  %409 = vmatpush.msra.mxu0 %v390_v19 }
  0x49   : > { %448 = vmatpush.msra.mxu1 %v433_v36 }
  0x4a   : > { %410 = vmatpush.msra.mxu0 %v389_v20 }
  0x4b   : > { %449 = vmatpush.msra.mxu1 %v432_v37 }
  0x4c   : > { %411 = vmatpush.msra.mxu0 %v388_v21 }
  0x4d   : > { %450 = vmatpush.msra.mxu1 %v431_v38 }
  0x4e   : > { %412 = vmatpush.msra.mxu0 %v387_v22 }
  0x4f   : > { %451 = vmatpush.msra.mxu1 %v430_v40 }
  0x50   : > { %413 = vmatpush.msra.mxu0 %v386_v23 }
  0x51   : > { %452 = vmatpush.msra.mxu1 %v429_v42 }
  0x52   : > { %414 = vmatpush.msra.mxu0 %v385_v24 }
  0x53   : > { %453 = vmatpush.msra.mxu1 %v428_v44 }
  0x54   : > { %415 = vmatpush.msra.mxu0 %v384_v25 }
  0x55   : > { %454 = vmatpush.msra.mxu1 %v427_v46 }
  0x56   : > { %416 = vmatpush.msra.mxu0 %v383_v26 }
  0x57   : > { %455 = vmatpush.msra.mxu1 %v426_v48 }
  0x58   : > { %417 = vmatpush.msra.mxu0 %v382_v27 }
  0x59   : > { %456 = vmatpush.msra.mxu1 %v425_v56 }
  0x5b   : > { %457 = vmatpush.msra.mxu1 %v424_v57 }
  0x5d   : > { %458 = vmatpush.msra.mxu1 %v423_v58 }
  0xac   : > { %v346_v10 = vpop.xlane.xlu0 %345 }
  0xad   : > { %v354_v11 = vmul.f32 %v353_v9, %v346_v10 }
  0xaf   : > { %v1059_v12 = vsub.f32 %v1055_v0, %v354_v11 }
  0xb1   : > { %v356_v13 = vmul.f32 %v1059_v12, %v1059_v12 }
  0xb3   : > { %357 = vadd.xlane.f32.xlu0 %v356_v13 }
 0x126   : > { %v358_v31 = vpop.xlane.xlu0 %357 }
 0x127   : > { %v359_v32 = vmul.f32 %v358_v31, %v353_v9 }
 0x129   : > { %v360_v34 = vadd.f32 1e-05, %v359_v32 }
 0x12b   : > { %684 = vrsqrt.f32 %v360_v34  ;;  %vm367_vm2 = vweird.f32 %v360_v34 }
 0x131   : > { %v685_v39 = vpop.eup %684 }
 0x132   : > { %v362_v41 = vmul.f32 %v685_v39, %v360_v34  ;;  %vm368_vm1 = vweird.f32 %v685_v39 }
 0x133   : > { %vm369_vm3 = vmor %vm367_vm2, %vm368_vm1 }
 0x134   : > { %v363_v43 = vmul.f32 %v685_v39, %v362_v41 }
 0x136   : > { %v364_v45 = vmul.f32 0.5, %v363_v43 }
 0x138   : > { %v365_v47 = vsub.f32 1.5, %v364_v45 }
 0x13a   : > { %v366_v49 = vmul.f32 %v685_v39, %v365_v47 }
 0x13c   : > { %v370_v51 = vsel %vm369_vm3, %v685_v39, %v366_v49 }
 0x13d   : > { %v371_v52 = vmul.f32 %v370_v51, %v1059_v12 }
 0x13f   : > { %v376_v54 = vmul.f32 %v678_v50, %v371_v52 }
 0x141   : > { %v381_v55 = vadd.f32 %v679_v53, %v376_v54 }
 0x143   : > { %418 = vmatmul.f32.vlgmr.msra.gmra.mxu0 %v381_v55 }
 0x1c0   : > { %v419_v60 = vpop.f32.mrf.mxu0 }
 0x1c1   : > { %v420_v61 = vadd.f32 %v680_v59, %v419_v60 }
 0x1c3   : > { %v422_v62 = vmax.f32 %v420_v61, 0.0 }
 0x1c5   : > { %459 = vmatmul.f32.vlgmr.msra.gmra.mxu1 %v422_v62 }
 0x242   : > { %v460_v1 = vpop.f32.mrf.mxu1 }
 0x243   : > { %v461_v2 = vadd.f32 %v681_v63, %v460_v1 }
 0x245   : > { %v463_v3 = vadd.f32 %v461_v2, %v1055_v0 }
 0x247   : > { %464 = vst [vmem:[%s343_s23] sm:$0xff] %v463_v3 }
 0x248   : > { %833 = shalt.err (!%p830_p11)
}
 0x249   : > { %612 = dma.vmem_to_hbm [thread:$0]  (%p1010_p3), %s479_s20, 128, %s481_s1, %s466_s28  }
 0x24a PF: > { %s492_s19 = sand.u32 1, %s868_s24   ;;  %p1125_p12 = scmp.ge.s32.totalorder %s880_s27, 2 }
 0x24b   : > { %s493_s15 = scalar_lea.sflag [#allocation4], %s492_s19 }
 0x24c   : > { %p629_p13 = pnand %p1125_p12, %p963_p6 }
 0x24e   : > { %p630_p0 = pneg %p629_p13 }
 0x250   : > { %863 = dma.done.wait (%p630_p0), %s493_s15, 128  }
 0x251   : > { %865 = vsyncadd (%p630_p0), %s493_s15, 4294967168  ;;  %p22_p5 = scmp.ge.s32.totalorder %s997_s11, 4   ;;  %s1126_s24 = smov %s872_s25 }
 0x252   : > { %s1127_s25 = smov %s876_s26  ;;  %s1128_s26 = smov %s1006_s16 }
 0x253   : > { %s1129_s27 = smov %s997_s11  ;;  %24 = sbr.rel (!%p22_p5) target bundleno = 9 (0x9), region = 105 }
 0x258   :  { %499 = vsyncpa [#allocation3], 1 }
 0x259   :  { %501 = vsyncpa [#allocation3 + $0x1], 1 }
 0x25a   :  { %502 = vsyncpa [#allocation6], 1 }
 0x25b   :  { %503 = vsyncpa [#allocation9], 1 }
 0x25c   :  { %504 = vsyncpa [#allocation4], 1 }
 0x25d   :  { %506 = vsyncpa [#allocation4 + $0x1], 1 }

</bundles_post_ra>
